<compile_context>
chip_gen: v7x
topology: tpu7x:2x2x1
jax: 0.10.0
libtpu: 0.0.40
codegen_flags: <defaults>
</compile_context>

<pallas_src>
import jax
import jax.numpy as jnp
from jax.experimental import pallas as pl
from jax.experimental.pallas import tpu as pltpu


# ---------------------------------------------------------------------------
# Kernels
# ---------------------------------------------------------------------------

def _spatial_attention_kernel_vpu(x_ref, w_ref, b_ref, o_ref):
    """Small-C path: unrolled VPU multiply-accumulate over channels.

    x_ref: (1, C, TW) VMEM tile
    w_ref: (C,)       SMEM f32 scalars
    b_ref: (1,)       SMEM f32 scalar
    o_ref: (1, 1, TW) VMEM tile
    """
    C = x_ref.shape[1]
    tw = x_ref.shape[2]
    acc = jnp.full((1, tw), b_ref[0], dtype=jnp.float32)
    for c in range(C):  # static unroll: C VALU FMAs per vreg, no MXU round trip
        acc = acc + w_ref[c] * x_ref[0, c:c + 1, :].astype(jnp.float32)
    o_ref[0] = acc.astype(o_ref.dtype)


def _spatial_attention_kernel_mxu(x_ref, w_ref, b_ref, o_ref):
    """Large-C path: (1, C) @ (C, TW) matmul on the MXU.

    x_ref: (1, C, TW) VMEM tile
    w_ref: (1, C)     VMEM (x.dtype), resident across the grid
    b_ref: (1,)       SMEM f32 scalar
    o_ref: (1, 1, TW) VMEM tile
    """
    acc = jnp.dot(w_ref[...], x_ref[0], preferred_element_type=jnp.float32)
    o_ref[0] = (acc + b_ref[0]).astype(o_ref.dtype)


# ---------------------------------------------------------------------------
# Tiling
# ---------------------------------------------------------------------------

def _choose_tile_w(N, HW, C, in_itemsize, out_itemsize,
                   vmem_budget_bytes=24 * (1 << 20),  # v7x-safe (64 MiB VMEM/TC)
                   min_steps=4, min_tile=1024):
    """Largest multiple-of-128 tile dividing HW that fits the VMEM budget,
    shrunk (not below min_tile) only if that gives the grid >= min_steps steps."""
    if HW <= 128 or HW % 128 != 0:
        return HW  # small / odd spatial size: one tile per image (full-dim block)
    candidates = [t for t in range(128, HW + 1, 128) if HW % t == 0]
    # double-buffered input + double-buffered output, per lane of the tile
    per_lane = 2 * (C * in_itemsize + out_itemsize)
    fitting = [t for t in candidates if t * per_lane <= vmem_budget_bytes]
    if not fitting:
        return 128
    tile = max(fitting)
    # Prefer a smaller tile if it yields enough grid steps (2 TCs on v7x +
    # pipeline steady state), but never drop below min_tile lanes.
    good = [t for t in fitting
            if N * (HW // t) >= min_steps and t >= min(min_tile, tile)]
    if good:
        tile = max(good)
    return tile


# ---------------------------------------------------------------------------
# Wrapper
# ---------------------------------------------------------------------------

def spatial_attention(x, weight, bias, *, tile_w=None):
    """1x1 conv: x (N,C,H,W) NCHW, weight (1,C,1,1), bias (1,) -> (N,1,H,W)."""
    N, C, H, W = x.shape
    HW = H * W
    in_itemsize = jnp.dtype(x.dtype).itemsize
    out_itemsize = in_itemsize

    if tile_w is None:
        tile_w = _choose_tile_w(N, HW, C, in_itemsize, out_itemsize)
    tile_w = min(tile_w, HW)
    assert HW % tile_w == 0, "spatial size must be divisible by tile_w"

    x_flat = x.reshape(N, C, HW)
    b_arg = bias.reshape(1).astype(jnp.float32)

    use_vpu = C <= 32
    if use_vpu:
        kernel = _spatial_attention_kernel_vpu
        w_arg = weight.reshape(C).astype(jnp.float32)
        w_spec = pl.BlockSpec(memory_space=pltpu.MemorySpace.SMEM)
    else:
        kernel = _spatial_attention_kernel_mxu
        # keep weight in x.dtype; f32 accumulation comes from preferred_element_type
        w_arg = weight.reshape(1, C).astype(x.dtype)
        w_spec = pl.BlockSpec((1, C), lambda b, j: (0, 0))

    # Explicit VMEM limit: double-buffered in/out tiles + headroom, v7x-safe cap.
    tile_bytes = 2 * (C * tile_w * in_itemsize + tile_w * out_itemsize)
    vmem_limit = int(min(48 * (1 << 20), max(16 * (1 << 20), 2 * tile_bytes)))

    cost = pl.CostEstimate(
        flops=2 * N * C * HW,
        transcendentals=0,
        bytes_accessed=N * C * HW * in_itemsize + N * HW * out_itemsize,
    )

    out = pl.pallas_call(
        kernel,
        out_shape=jax.ShapeDtypeStruct((N, 1, HW), x.dtype),
        grid_spec=pltpu.PrefetchScalarGridSpec(
            num_scalar_prefetch=0,
            grid=(N, HW // tile_w),
            in_specs=[
                pl.BlockSpec((1, C, tile_w), lambda b, j: (b, 0, j)),
                w_spec,
                pl.BlockSpec(memory_space=pltpu.MemorySpace.SMEM),
            ],
            out_specs=pl.BlockSpec((1, 1, tile_w), lambda b, j: (b, 0, j)),
        ),
        compiler_params=pltpu.CompilerParams(
            dimension_semantics=("parallel", "parallel"),
            vmem_limit_bytes=vmem_limit,
        ),
        cost_estimate=cost,
    )(x_flat, w_arg, b_arg)

    return out.reshape(N, 1, H, W)


# ---------------------------------------------------------------------------
# Self-test
# ---------------------------------------------------------------------------

if __name__ == "__main__":
    key = jax.random.PRNGKey(0)
    k_x, k_w, k_b = jax.random.split(key, 3)

    N, C, H, W = 2, 4, 16, 16
    x = jax.random.normal(k_x, (N, C, H, W), dtype=jnp.float32)

    # Deterministic synthetic parameters (same shapes as nn.Conv2d(dim, 1, 1, bias=True)).
    weight = jax.random.normal(k_w, (1, C, 1, 1), dtype=jnp.float32) * 0.1
    bias = jax.random.normal(k_b, (1,), dtype=jnp.float32) * 0.1

    out = spatial_attention(x, weight, bias)
    out = jax.block_until_ready(out)

    # Pure-JAX reference of the 1x1 conv.
    ref = jnp.einsum("nchw,c->nhw", x, weight.reshape(C)) + bias[0]
    ref = ref[:, None, :, :]

    assert out.shape == (N, 1, H, W), out.shape
    assert jnp.allclose(out, ref, atol=1e-5, rtol=1e-5), (
        float(jnp.max(jnp.abs(out - ref))))

    print("KERNEL_OK")
</pallas_src>

<mosaic_0001>
module attributes {stable_mosaic.version = 11 : i64} {
  func.func @_spatial_attention_kernel_vpu(%arg0: i32, %arg1: i32, %arg2: memref<1x4x256xf32, #tpu.memory_space<vmem>>, %arg3: memref<4xf32, #tpu.memory_space<smem>>, %arg4: memref<1xf32, #tpu.memory_space<smem>>, %arg5: memref<1x1x256xf32, #tpu.memory_space<vmem>>) attributes {dimension_semantics = [#tpu.dimension_semantics<parallel>, #tpu.dimension_semantics<parallel>], iteration_bounds = array<i64: 2, 1>, scalar_prefetch = 0 : i64, scratch_operands = 0 : i64, tpu.core_type = #tpu.core_type<tc>, window_params = [{transform_indices = @transform_0, window_bounds = array<i64: 1, 4, 256>}, {transform_indices = @transform_1, window_bounds = array<i64: 4>}, {transform_indices = @transform_2, window_bounds = array<i64: 1>}, {transform_indices = @transform_3, window_bounds = array<i64: 1, 1, 256>}]} {
    %c0 = arith.constant 0 : index
    %0 = memref.load %arg4[%c0] : memref<1xf32, #tpu.memory_space<smem>>
    %1 = vector.broadcast %0 : f32 to vector<1x256xf32>
    %c0_0 = arith.constant 0 : index
    %2 = memref.load %arg3[%c0_0] : memref<4xf32, #tpu.memory_space<smem>>
    %c0_1 = arith.constant 0 : index
    %c0_2 = arith.constant 0 : index
    %c0_3 = arith.constant 0 : index
    %3 = vector.load %arg2[%c0_1, %c0_2, %c0_3] : memref<1x4x256xf32, #tpu.memory_space<vmem>>, vector<1x1x256xf32>
    %4 = vector.shape_cast %3 : vector<1x1x256xf32> to vector<1x256xf32>
    %5 = vector.broadcast %2 : f32 to vector<1x256xf32>
    %6 = arith.mulf %5, %4 : vector<1x256xf32>
    %7 = arith.addf %1, %6 : vector<1x256xf32>
    %c1 = arith.constant 1 : index
    %8 = memref.load %arg3[%c1] : memref<4xf32, #tpu.memory_space<smem>>
    %c0_4 = arith.constant 0 : index
    %c1_5 = arith.constant 1 : index
    %c0_6 = arith.constant 0 : index
    %9 = vector.load %arg2[%c0_4, %c1_5, %c0_6] : memref<1x4x256xf32, #tpu.memory_space<vmem>>, vector<1x1x256xf32>
    %10 = vector.shape_cast %9 : vector<1x1x256xf32> to vector<1x256xf32>
    %11 = vector.broadcast %8 : f32 to vector<1x256xf32>
    %12 = arith.mulf %11, %10 : vector<1x256xf32>
    %13 = arith.addf %7, %12 : vector<1x256xf32>
    %c2 = arith.constant 2 : index
    %14 = memref.load %arg3[%c2] : memref<4xf32, #tpu.memory_space<smem>>
    %c0_7 = arith.constant 0 : index
    %c2_8 = arith.constant 2 : index
    %c0_9 = arith.constant 0 : index
    %15 = vector.load %arg2[%c0_7, %c2_8, %c0_9] : memref<1x4x256xf32, #tpu.memory_space<vmem>>, vector<1x1x256xf32>
    %16 = vector.shape_cast %15 : vector<1x1x256xf32> to vector<1x256xf32>
    %17 = vector.broadcast %14 : f32 to vector<1x256xf32>
    %18 = arith.mulf %17, %16 : vector<1x256xf32>
    %19 = arith.addf %13, %18 : vector<1x256xf32>
    %c3 = arith.constant 3 : index
    %20 = memref.load %arg3[%c3] : memref<4xf32, #tpu.memory_space<smem>>
    %c0_10 = arith.constant 0 : index
    %c3_11 = arith.constant 3 : index
    %c0_12 = arith.constant 0 : index
    %21 = vector.load %arg2[%c0_10, %c3_11, %c0_12] : memref<1x4x256xf32, #tpu.memory_space<vmem>>, vector<1x1x256xf32>
    %22 = vector.shape_cast %21 : vector<1x1x256xf32> to vector<1x256xf32>
    %23 = vector.broadcast %20 : f32 to vector<1x256xf32>
    %24 = arith.mulf %23, %22 : vector<1x256xf32>
    %25 = arith.addf %19, %24 : vector<1x256xf32>
    %c0_13 = arith.constant 0 : index
    %c0_14 = arith.constant 0 : index
    %c0_15 = arith.constant 0 : index
    %26 = vector.load %arg5[%c0_13, %c0_14, %c0_15] : memref<1x1x256xf32, #tpu.memory_space<vmem>>, vector<1x1x256xf32>
    %27 = vector.shape_cast %26 : vector<1x1x256xf32> to vector<1x256xf32>
    %28 = vector.shape_cast %25 : vector<1x256xf32> to vector<1x1x256xf32>
    tpu.vector_store %arg5[%c0_13, %c0_14, %c0_15], %28 {strides = array<i32>} : memref<1x1x256xf32, #tpu.memory_space<vmem>>, vector<1x1x256xf32>,
    return
  }
  func.func @transform_0(%arg0: i32, %arg1: i32) -> (i32, i32, i32) {
    %c0_i32 = arith.constant 0 : i32
    %c0_i32_0 = arith.constant 0 : i32
    return %arg0, %c0_i32, %arg1 : i32, i32, i32
  }
  func.func @transform_1(%arg0: i32, %arg1: i32) -> i32 {
    %c0_i32 = arith.constant 0 : i32
    %c0_i32_0 = arith.constant 0 : i32
    return %c0_i32 : i32
  }
  func.func @transform_2(%arg0: i32, %arg1: i32) -> i32 {
    %c0_i32 = arith.constant 0 : i32
    %c0_i32_0 = arith.constant 0 : i32
    return %c0_i32 : i32
  }
  func.func @transform_3(%arg0: i32, %arg1: i32) -> (i32, i32, i32) {
    %c0_i32 = arith.constant 0 : i32
    %c0_i32_0 = arith.constant 0 : i32
    return %arg0, %c0_i32, %arg1 : i32, i32, i32
  }
}

</mosaic_0001>

<bundles_post_ra>
// kernel: tpu_custom_call.1
= control target key start
LH: loop header
LB: loop body
LE: loop exit
PB: predicated region body
PF: predicated region fallthrough
CT: control target
= control target key end

     0   :  { %s822_s0 = inlined_call_operand.hbm [shape: f32[2,4,256], index: 0, kind: input, shape index: {}]   ;;  %s823_s1 = inlined_call_operand.vmem [shape: f32[4], index: 1, kind: input, shape index: {}]   ;;  %s824_s2 = inlined_call_operand.<no memory space> [shape: f32[1], index: 2, kind: input, shape index: {}]   ;;  %s825_s3 = inlined_call_operand.hbm [shape: f32[2,1,256], index: 3, kind: output, shape index: {}]  }
   0x1   :  { %8 = sst [smem:[#allocation2]] %s824_s2 }
   0x2   :  { %9 = vsyncpa [#allocation4], 0 }
   0x3   :  { %11 = vsyncpa [#allocation4 + $0x1], 0 }
   0x4   :  { %12 = vsyncpa [#allocation6], 0 }
   0x5   :  { %13 = vsyncpa [#allocation5], 0 }
   0x6   :  { %15 = vsyncpa [#allocation5 + $0x1], 0  ;;  %s622_s14 = smov 0   ;;  %s624_s15 = smov 0  }
   0x7   :  { %s626_s16 = smov 0   ;;  %s628_s17 = smov 0  }
   0x8   :  { %s630_s18 = smov 0   ;;  %s632_s19 = smov 0  }
   0x9 LB: > { %s365_s2 = sadd.s32 4294967295, %s594_s19   ;;  %s366_s20 = sadd.s32 4294967294, %s594_s19   ;;  %s594_s19 = sphi %s632_s19, %s21_s19   ;;  %s590_s18 = sphi %s630_s18, %s847_s18   ;;  %s586_s17 = sphi %s628_s17, %s846_s17   ;;  %s582_s16 = sphi %s626_s16, %s845_s16   ;;  %s578_s15 = sphi %s624_s15, %s844_s15   ;;  %s574_s14 = sphi %s622_s14, %s843_s14  }
   0xa   : > { %p55_p0 = scmp.ne.s32.totalorder %s578_s15, %s574_s14  ;;  %p656_p1 = scmp.eq.s32.totalorder %s365_s2, 0 }
   0xb   : > { %p660_p2 = scmp.eq.s32.totalorder %s365_s2, 1  ;;  %p129_p3 = scmp.eq.s32.totalorder %s366_s20, 1 }
   0xc   : > { %s830_s21 = scalar_select %p656_p1, 1, 0 }
   0xd   : > { %p666_p4 = por %p656_p1, %p55_p0  ;;  %p367_p5 = scmp.ge.s32.totalorder %s594_s19, 1 }
   0xe   : > { %p671_p6 = por %p129_p3, %p55_p0  ;;  %p136_p7 = scmp.lt.s32.totalorder %s594_s19, 3 }
   0xf   : > { %s832_s23 = scalar_select %p666_p4, 1, 0 }
  0x10   : > { %s833_s24 = scalar_select %p671_p6, 1, 0 }
  0x11   : > { %s149_s27 = sshll.u32 %s823_s1, 4  ;;  %p679_p8 = pnand %p367_p5, %p136_p7  ;;  %s150_s27 = int_to_ptr.vmem [resolvable:$true] %s149_s27 }
  0x12   : > { %s33_s30 = sadd.s32 1, %s590_s18  ;;  %s42_s4 = sadd.s32 1, %s582_s16 }
  0x13   : > { %p398_p10 = pneg %p679_p8  ;;  %p35_p12 = scmp.ge.s32.totalorder %s33_s30, 2 }
  0x14   : > { %s463_s5 = scalar_lea.vmem %s150_s27, 16  ;;  %p471_p7 = scmp.lt.s32.totalorder %s150_s27, %s150_s27 }
  0x15   : > { %p688_p11 = pnand %p398_p10, %p656_p1  ;;  %p464_p13 = scmp.ne.s32.totalorder %s150_s27, %s463_s5 }
  0x16   : > { %p472_p6 = scmp.lt.s32.totalorder %s463_s5, %s463_s5 }
  0x17   : > { %p465_p0 = pneg %p688_p11 }
  0x18   : > { %p473_p9 = por %p472_p6, %p471_p7 }
  0x19   : > { %p466_p3 = pnand %p465_p0, %p464_p13 }
  0x1b   : > { %p467_p5 = pneg %p466_p3 }
  0x1d   : > { %p474_p4 = pnand %p473_p9, %p467_p5 }
  0x1f   : > { %477 = shalt.err (!%p474_p4)
}
  0x20   : > { %s596_s6 = smov [#allocation7]   ;;  %s849_s30 = smov (%p35_p12, %s33_s30), 0 }
  0x21   : > { %401 = dma.vmem_to_smem (!%p688_p11), %s150_s27, 16, %s596_s6, [#allocation6]  }
  0x22   : > { %p49_p10 = scmp.ne.s32.totalorder %s582_s16, %s578_s15  ;;  %p50_p6 = scmp.eq.s32.totalorder %s594_s19, 0 }
  0x23   : > { %s37_s7 = ssub.s32 %s590_s18, %s849_s30  ;;  %p411_p4 = scmp.lt.s32.totalorder %s594_s19, 2 }
  0x24   : > { %p40_p9 = scmp.eq.s32.totalorder %s37_s7, 0  ;;  %p51_p13 = por %p50_p6, %p49_p10 }
  0x25   : > { %p708_p0 = por %p660_p2, %p49_p10  ;;  %s163_s9 = sand.u32 1, %s582_s16  }
  0x26   : > { %s714_s10 = scalar_select %p40_p9, %s582_s16, %s42_s4  }
  0x27   : > { %s836_s8 = scalar_select %p708_p0, 1, 0 }
  0x28   : > { %s370_s11 = sshll.u32 %s163_s9, 3  ;;  %s388_s12 = sshll.u32 %s590_s18, 7 }
  0x29   : > { %s720_s20 = scalar_lea.hbm %s822_s0, %s388_s12  ;;  %s167_s25 = scalar_lea.vmem [#allocation3], %s370_s11 }
  0x2a   : > { %s177_s22 = sshll.u32 %s167_s25, 4  ;;  %p724_p2 = pnand %p411_p4, %p51_p13  ;;  %s722_s22 = int_to_ptr.vmem [resolvable:$true] %s177_s22 }
  0x2b   : > { %s164_s27 = scalar_lea.sflag [#allocation4], %s163_s9  ;;  %s478_s29 = scalar_lea.hbm %s720_s20, 128 }
  0x2c   : > { %p479_p11 = scmp.ne.s32.totalorder %s720_s20, %s478_s29  ;;  %p480_p12 = pneg %p724_p2 }
  0x2d   : > { %s483_s6 = scalar_lea.hbm %s822_s0, 256  ;;  %p484_p7 = scmp.lt.u32.totalorder %s720_s20, %s822_s0 }
  0x2e   : > { %p481_p3 = pnand %p480_p12, %p479_p11  ;;  %p485_p10 = scmp.lt.u32.totalorder %s483_s6, %s478_s29 }
  0x2f   : > { %p487_p4 = scmp.lt.u32.totalorder %s478_s29, %s720_s20 }
  0x30   : > { %p482_p5 = pneg %p481_p3  ;;  %p486_p6 = por %p485_p10, %p484_p7 }
  0x32   : > { %p488_p9 = por %p487_p4, %p486_p6 }
  0x34   : > { %p489_p13 = pnand %p488_p9, %p482_p5 }
  0x36   : > { %492 = shalt.err (!%p489_p13)
}
  0x37   : > { %s493_s9 = scalar_lea.vmem %s722_s22, 128  ;;  %s597_s12 = smov [#allocation3]  }
  0x38   : > { %p494_p11 = scmp.ne.s32.totalorder %s722_s22, %s493_s9  ;;  %s498_s13 = sshll.u32 %s597_s12, 4  ;;  %s499_s13 = int_to_ptr.vmem [resolvable:$false] %s498_s13 }
  0x39   : > { %s500_s2 = scalar_lea.vmem %s499_s13, 256  ;;  %p501_p1 = scmp.lt.s32.totalorder %s722_s22, %s499_s13 }
  0x3a   : > { %p496_p3 = pnand %p494_p11, %p480_p12  ;;  %p502_p7 = scmp.lt.s32.totalorder %s500_s2, %s493_s9 }
  0x3c   : > { %p497_p0 = pneg %p496_p3  ;;  %p503_p10 = por %p502_p7, %p501_p1 }
  0x3e   : > { %p504_p6 = pnand %p503_p10, %p497_p0 }
  0x40   : > { %507 = shalt.err (!%p504_p6)
}
  0x41   : > { %405 = dma.hbm_to_vmem [thread:$0]  (!%p724_p2), %s720_s20, 128, %s722_s22, %s164_s27  }
  0x42   : > { %186 = sbr.rel (%p679_p8) target bundleno = 111 (0x6f), region = 32  ;;  %s756_s25 = sand.u32 (!%p679_p8), 1, %s578_s15  }
  0x43   : > { %s374_s29 = sshll.u32 (!%p679_p8), %s756_s25, 3  ;;  %s189_s4 = scalar_lea.sflag (!%p679_p8), [#allocation4], %s756_s25 }
  0x44   : > { %s192_s5 = scalar_lea.vmem (!%p679_p8), [#allocation3], %s374_s29  ;;  %p838_p1 = scmp.ne.s32.totalorder (!%p679_p8), %s832_s23, 0 }
  0x49   : > { %561 = dma.done.wait (%p838_p1), %s189_s4, 128  }
  0x4a   : > { %563 = vsyncadd (%p838_p1), %s189_s4, 4294967168  ;;  %p839_p0 = scmp.ne.s32.totalorder %s830_s21, 0 }
  0x4c   : > { %565 = dma.done.wait (%p839_p0), [#allocation6], 16  }
  0x4d   : > { %567 = vsyncadd (%p839_p0), [#allocation6], 4294967280 }
  0x4e   : > { %201 = sfence }
  0x4f   : > { %s222_s28 = sld [smem:[#allocation2]]  ;;  %s377_s22 = sld [smem:[#allocation7 + $0x1]]  ;;  %v225_v0 = vld [vmem:[%s192_s5] ss:$4 sm:$0x3]  ;;  %v247_v13 = vlaneseq }
  0x50   : > { %s224_s20 = sld [smem:[#allocation7]]  ;;  %s379_s26 = sld [smem:[#allocation7 + $0x2]]  ;;  %v378_v1 = vld [vmem:[%s192_s5 + $0x1] ss:$4 sm:$0x3] }
  0x51   : > { %s381_s27 = sld [smem:[#allocation7 + $0x3]]  ;;  %s376_s6 = sshll.u32 %s756_s25, 1  ;;  %v380_v4 = vld [vmem:[%s192_s5 + $0x2] ss:$4 sm:$0x3]  ;;  %vm249_vm0 = vcmp.lt.s32.totalorder %v247_v13, 256 }
  0x52   : > { %v382_v9 = vld [vmem:[%s192_s5 + $0x3] ss:$4 sm:$0x3]  ;;  %s219_s21 = scalar_lea.vmem [#allocation8], %s376_s6  ;;  %s389_s7 = sshll.u32 %s586_s17, 5 }
  0x53   : > { %s269_s23 = sshll.u32 %s219_s21, 4  ;;  %s775_s12 = scalar_lea.hbm %s825_s3, %s389_s7  ;;  %s770_s23 = int_to_ptr.vmem [resolvable:$true] %s269_s23 }
  0x54   : > { %s253_s13 = scalar_lea.sflag [#allocation5], %s756_s25  ;;  %s508_s2 = scalar_lea.vmem %s770_s23, 32 }
  0x55   : > { %v223_v2 = vstv %s222_s28  ;;  %v232_v6 = vstv %s377_s22  ;;  %p509_p8 = scmp.ne.s32.totalorder %s770_s23, %s508_s2  ;;  %p840_p2 = scmp.ne.s32.totalorder %s836_s8, 0 }
  0x56   : > { %v226_v3 = vstv %s224_s20  ;;  %v238_v7 = vstv %s379_s26  ;;  %v233_v8 = vmul.f32 %v378_v1, %v232_v6  ;;  %s598_s17 = smov [#allocation8]  }
  0x57   : > { %v227_v5 = vmul.f32 %v226_v3, %v225_v0  ;;  %v244_v10 = vstv %s381_s27  ;;  %v239_v12 = vmul.f32 %v380_v4, %v238_v7  ;;  %p510_p12 = pnand %p509_p8, %p840_p2  ;;  %s512_s29 = sshll.u32 %s598_s17, 4  ;;  %s513_s29 = int_to_ptr.vmem [resolvable:$false] %s512_s29 }
  0x58   : > { %v245_v15 = vmul.f32 %v382_v9, %v244_v10  ;;  %s514_s4 = scalar_lea.vmem %s513_s29, 64  ;;  %p515_p4 = scmp.lt.s32.totalorder %s770_s23, %s513_s29 }
  0x59   : > { %v228_v11 = vadd.f32 %v227_v5, %v223_v2  ;;  %p511_p5 = pneg %p510_p12  ;;  %p516_p9 = scmp.lt.s32.totalorder %s514_s4, %s508_s2 }
  0x5b   : > { %v234_v14 = vadd.f32 %v233_v8, %v228_v11  ;;  %p517_p13 = por %p516_p9, %p515_p4 }
  0x5d   : > { %v240_v16 = vadd.f32 %v239_v12, %v234_v14  ;;  %p518_p11 = pnand %p517_p13, %p511_p5 }
  0x5f   : > { %v246_v17 = vadd.f32 %v245_v15, %v240_v16 }
  0x61   : > { %251 = vst.msk [vmem:[%s219_s21] sm:$0x3] %vm249_vm0, %v246_v17 }
  0x62   : > { %521 = shalt.err (!%p518_p11)
}
  0x63   : > { %s522_s25 = scalar_lea.hbm %s775_s12, 32  ;;  %s526_s20 = scalar_lea.hbm %s825_s3, 64 }
  0x64   : > { %p523_p3 = scmp.ne.s32.totalorder %s775_s12, %s522_s25  ;;  %p527_p6 = scmp.lt.u32.totalorder %s775_s12, %s825_s3 }
  0x65   : > { %p528_p1 = scmp.lt.u32.totalorder %s526_s20, %s522_s25  ;;  %p530_p8 = scmp.lt.u32.totalorder %s522_s25, %s775_s12 }
  0x66   : > { %p524_p7 = pnand %p523_p3, %p840_p2 }
  0x67   : > { %p529_p0 = por %p528_p1, %p527_p6 }
  0x68   : > { %p525_p10 = pneg %p524_p7 }
  0x69   : > { %p531_p12 = por %p530_p8, %p529_p0 }
  0x6b   : > { %p532_p5 = pnand %p531_p12, %p525_p10 }
  0x6d   : > { %535 = shalt.err (!%p532_p5)
}
  0x6e   : > { %396 = dma.vmem_to_hbm [thread:$0]  (%p840_p2), %s770_s23, 32, %s775_s12, %s253_s13  }
  0x6f PF: > { %s281_s27 = sand.u32 1, %s574_s14   ;;  %p841_p4 = scmp.ne.s32.totalorder %s833_s24, 0 }
  0x70   : > { %p842_p9 = scmp.ge.s32.totalorder %s594_s19, 2  ;;  %s282_s6 = scalar_lea.sflag [#allocation5], %s281_s27 }
  0x72   : > { %p407_p13 = pnand %p842_p9, %p841_p4 }
  0x74   : > { %569 = dma.done.wait (!%p407_p13), %s282_s6, 32  }
  0x75   : > { %571 = vsyncadd (!%p407_p13), %s282_s6, 4294967264  ;;  %s21_s19 = sadd.s32 1, %s594_s19   ;;  %s843_s14 = smov %s578_s15 }
  0x76   : > { %p18_p11 = scmp.ge.s32.totalorder %s21_s19, 4   ;;  %s844_s15 = smov %s582_s16 }
  0x77   : > { %s845_s16 = smov %s714_s10  ;;  %s846_s17 = smov %s590_s18 }
  0x78   : > { %s847_s18 = smov %s849_s30  ;;  %20 = sbr.rel (!%p18_p11) target bundleno = 9 (0x9), region = 85 }
  0x7f   :  { %287 = vsyncpa [#allocation4], 1 }
  0x80   :  { %289 = vsyncpa [#allocation4 + $0x1], 1 }
  0x81   :  { %290 = vsyncpa [#allocation5], 1 }
  0x82   :  { %292 = vsyncpa [#allocation5 + $0x1], 1 }
  0x83   :  { %293 = vsyncpa [#allocation6], 1 }
  0x84   :  { %295 = vsyncpa [#allocation6 + $0x1], 1 }

</bundles_post_ra>
